<compile_context>
chip_gen: v6e
topology: v6e:2x2x1
jax: 0.10.0
libtpu: 0.0.40
codegen_flags: <defaults>
</compile_context>

<pallas_src>
import jax
import jax.numpy as jnp
from jax.experimental import pallas as pl
from jax.experimental.pallas import tpu as pltpu

LANE = 128


def _round_up(a, b):
    return (a + b - 1) // b * b


# ----------------------------------------------------------------------------
# Kernel: fused two-layer MLP  relu(relu(x @ w1 + b1) @ w2 + b2)
#   x  : (tm, F)  f32  (cast to bf16 in-kernel)
#   w1 : (F, Ep)  bf16     b1 : (1, Ep) f32
#   w2 : (Ep, Ep) bf16     b2 : (1, Ep) f32
#   o  : (tm, Ep) out_dtype
# Padded E-lanes of w/b are zero, so padded output lanes stay exactly zero
# through both Linear+ReLU layers (numerically exact).
# ----------------------------------------------------------------------------
def _embed_kernel(x_ref, w1_ref, b1_ref, w2_ref, b2_ref, o_ref):
    # Layer 1: Linear(F -> E) + ReLU.  bf16 operands, f32 MXU accumulation.
    x = x_ref[...].astype(jnp.bfloat16)
    h = jnp.dot(x, w1_ref[...], preferred_element_type=jnp.float32)
    h = jnp.maximum(h + b1_ref[...], 0.0)          # (1, Ep) broadcasts over rows

    # Layer 2: Linear(E -> E) + ReLU
    y = jnp.dot(h.astype(jnp.bfloat16), w2_ref[...],
                preferred_element_type=jnp.float32)
    y = jnp.maximum(y + b2_ref[...], 0.0)

    o_ref[...] = y.astype(o_ref.dtype)


def prepare_params(w1, b1, w2, b2):
    """One-time weight prep (hoisted out of the per-call path).

    Stores weights as (in_features, out_features) with the *output* feature dim
    zero-padded to 128 lanes, operands in bf16, biases in f32.
    Returns (w1p, b1p, w2p, b2p).
    """
    F, E = w1.shape
    assert b1.shape == (1, E) and w2.shape == (E, E) and b2.shape == (1, E)
    Ep = _round_up(E, LANE)
    w1p = jnp.zeros((F, Ep), jnp.bfloat16).at[:, :E].set(w1.astype(jnp.bfloat16))
    w2p = jnp.zeros((Ep, Ep), jnp.bfloat16).at[:E, :E].set(w2.astype(jnp.bfloat16))
    b1p = jnp.zeros((1, Ep), jnp.float32).at[:, :E].set(b1.astype(jnp.float32))
    b2p = jnp.zeros((1, Ep), jnp.float32).at[:, :E].set(b2.astype(jnp.float32))
    return w1p, b1p, w2p, b2p


def object_embed_net(x, params, embed_size, *, tm=2048,
                     out_dtype=jnp.bfloat16, min_pallas_rows=64):
    """Batched ObjectEmbedNet forward.

    x       : (N, F) stacked children features (f32, unpadded).
    params  : output of prepare_params() (padded bf16 weights, f32 biases).
    Returns (N, embed_size) embeddings in `out_dtype`.
    """
    w1p, b1p, w2p, b2p = params
    N, F = x.shape
    Ep = w1p.shape[1]
    assert w1p.shape == (F, Ep) and w2p.shape == (Ep, Ep)
    assert embed_size <= Ep

    # Tiny batches: pallas_call dispatch + wrapper ops dominate; plain XLA wins.
    if N < min_pallas_rows:
        xb = x.astype(jnp.bfloat16)
        h = jnp.maximum(
            jnp.dot(xb, w1p, preferred_element_type=jnp.float32) + b1p, 0.0)
        y = jnp.maximum(
            jnp.dot(h.astype(jnp.bfloat16), w2p,
                    preferred_element_type=jnp.float32) + b2p, 0.0)
        return y[:, :embed_size].astype(out_dtype)

    # Row tile: multiple of 16 (bf16 sublane packing).  When N > tm, nudge the
    # step count to an even number so v7x's 2 TensorCores split evenly.
    if N <= tm:
        tm_eff = _round_up(N, 16)
    else:
        n_steps = pl.cdiv(N, tm)
        if n_steps % 2:
            n_steps += 1
        tm_eff = _round_up(pl.cdiv(N, n_steps), 16)
    grid = (pl.cdiv(N, tm_eff),)   # ragged last block handled by Pallas masking

    out_bytes = jnp.dtype(out_dtype).itemsize
    flops = 2 * N * F * Ep + 2 * N * Ep * Ep
    bytes_accessed = (N * F * x.dtype.itemsize
                      + w1p.size * 2 + w2p.size * 2
                      + b1p.size * 4 + b2p.size * 4
                      + N * Ep * out_bytes)

    out = pl.pallas_call(
        _embed_kernel,
        out_shape=jax.ShapeDtypeStruct((N, Ep), out_dtype),
        grid=grid,
        in_specs=[
            # Activation row-tile streams per grid step; last dim == full F
            # (legal: block dim equal to full array dim), so x is read unpadded.
            pl.BlockSpec((tm_eff, F), lambda i: (i, 0)),
            # Weights / biases: constant block index -> DMA'd once, VMEM-resident.
            pl.BlockSpec((F, Ep), lambda i: (0, 0)),
            pl.BlockSpec((1, Ep), lambda i: (0, 0)),
            pl.BlockSpec((Ep, Ep), lambda i: (0, 0)),
            pl.BlockSpec((1, Ep), lambda i: (0, 0)),
        ],
        out_specs=pl.BlockSpec((tm_eff, Ep), lambda i: (i, 0)),
        compiler_params=pltpu.CompilerParams(
            dimension_semantics=("parallel",),      # independent row tiles
            vmem_limit_bytes=16 * 1024 * 1024,      # kernel needs ~1.5 MiB
        ),
        cost_estimate=pl.CostEstimate(
            flops=flops, transcendentals=0, bytes_accessed=bytes_accessed),
    )(x, w1p, b1p, w2p, b2p)

    # Slice off the lane padding (rows are already exact: Pallas masks the
    # ragged last block's out-of-range rows).
    return out[:, :embed_size]


def init_params(key, node_features_size, embed_size):
    """Deterministic init mimicking nn.Linear default (uniform +/- 1/sqrt(fan_in)).
    Weights stored as (in_features, out_features)."""
    k1, k2, k3, k4 = jax.random.split(key, 4)
    bound1 = 1.0 / jnp.sqrt(node_features_size)
    bound2 = 1.0 / jnp.sqrt(embed_size)
    w1 = jax.random.uniform(k1, (node_features_size, embed_size),
                            jnp.float32, -bound1, bound1)
    b1 = jax.random.uniform(k2, (1, embed_size), jnp.float32, -bound1, bound1)
    w2 = jax.random.uniform(k3, (embed_size, embed_size),
                            jnp.float32, -bound2, bound2)
    b2 = jax.random.uniform(k4, (1, embed_size), jnp.float32, -bound2, bound2)
    return w1, b1, w2, b2


def _reference(x, w1, b1, w2, b2):
    """Pure-JAX reference emulating the kernel's bf16-operand / f32-accum math."""
    xb = x.astype(jnp.bfloat16).astype(jnp.float32)
    w1b = w1.astype(jnp.bfloat16).astype(jnp.float32)
    w2b = w2.astype(jnp.bfloat16).astype(jnp.float32)
    h = jnp.maximum(xb @ w1b + b1, 0.0)
    h = h.astype(jnp.bfloat16).astype(jnp.float32)
    return jnp.maximum(h @ w2b + b2, 0.0)


if __name__ == "__main__":
    # Small shapes consistent with the module: N children nodes, each with a
    # node feature vector; node_features_size <= 100 so the resnet branch is skipped.
    N = 8
    node_features_size = 32
    embed_size = 32

    key = jax.random.PRNGKey(0)
    kx, kp, kb = jax.random.split(key, 3)

    # children_features: list of N vectors -> stacked into (N, F)
    children = [jax.random.normal(jax.random.fold_in(kx, i),
                                  (node_features_size,), jnp.float32)
                for i in range(N)]
    x = jnp.stack(children)     # torch.stack(children_features)

    w1, b1, w2, b2 = init_params(kp, node_features_size, embed_size)
    params = prepare_params(w1, b1, w2, b2)      # one-time, hoisted weight prep

    # --- semantic check at the module's natural (small) shape, forced through
    #     the Pallas kernel (min_pallas_rows=0) --------------------------------
    out = object_embed_net(x, params, embed_size, min_pallas_rows=0)
    out = jax.block_until_ready(out)
    assert out.shape == (N, embed_size)

    ref = _reference(x, w1, b1, w2, b2)
    out_f32 = out.astype(jnp.float32)
    assert jnp.allclose(out_f32, ref, atol=2e-2, rtol=2e-2), "mismatch vs bf16 reference"

    ref_f32 = jnp.maximum(jnp.maximum(x @ w1 + b1, 0.0) @ w2 + b2, 0.0)
    assert jnp.allclose(out_f32, ref_f32, atol=1e-1, rtol=1e-1), "mismatch vs f32 reference"

    # Small-N production path (bypasses Pallas below the row threshold) must agree.
    out_fallback = object_embed_net(x, params, embed_size)   # N=8 < min_pallas_rows
    out_fallback = jax.block_until_ready(out_fallback)
    assert jnp.allclose(out_fallback.astype(jnp.float32), out_f32,
                        atol=2e-2, rtol=2e-2), "fallback path mismatch"

    # torch.unbind(embedding) -> tuple of per-node embeddings
    embeddings = tuple(out[i] for i in range(N))
    assert len(embeddings) == N and embeddings[0].shape == (embed_size,)

    # --- batched path: many objects in one call; exercises even-grid split and
    #     the ragged (cdiv) last block -----------------------------------------
    M = 5000
    xb_big = jax.random.normal(kb, (M, node_features_size), jnp.float32)
    out_big = object_embed_net(xb_big, params, embed_size, tm=2048)
    out_big = jax.block_until_ready(out_big)
    assert out_big.shape == (M, embed_size)
    ref_big = _reference(xb_big, w1, b1, w2, b2)
    assert jnp.allclose(out_big.astype(jnp.float32), ref_big,
                        atol=2e-2, rtol=2e-2), "batched mismatch"

    print("KERNEL_OK")
</pallas_src>

<mosaic_0001>
module attributes {stable_mosaic.version = 11 : i64} {
  func.func @_embed_kernel(%arg0: i32, %arg1: memref<16x32xf32, #tpu.memory_space<vmem>>, %arg2: memref<32x128xbf16, #tpu.memory_space<vmem>>, %arg3: memref<1x128xf32, #tpu.memory_space<vmem>>, %arg4: memref<128x128xbf16, #tpu.memory_space<vmem>>, %arg5: memref<1x128xf32, #tpu.memory_space<vmem>>, %arg6: memref<16x128xbf16, #tpu.memory_space<vmem>>) attributes {dimension_semantics = [#tpu.dimension_semantics<parallel>], iteration_bounds = array<i64: 1>, scalar_prefetch = 0 : i64, scratch_operands = 0 : i64, tpu.core_type = #tpu.core_type<tc>, window_params = [{transform_indices = @transform_0, window_bounds = array<i64: 16, 32>}, {pipeline_mode = #tpu.pipeline_mode<synchronous>, transform_indices = @transform_1, window_bounds = array<i64: 32, 128>}, {pipeline_mode = #tpu.pipeline_mode<synchronous>, transform_indices = @transform_2, window_bounds = array<i64: 1, 128>}, {pipeline_mode = #tpu.pipeline_mode<synchronous>, transform_indices = @transform_3, window_bounds = array<i64: 128, 128>}, {pipeline_mode = #tpu.pipeline_mode<synchronous>, transform_indices = @transform_4, window_bounds = array<i64: 1, 128>}, {transform_indices = @transform_5, window_bounds = array<i64: 16, 128>}]} {
    %c0 = arith.constant 0 : index
    %c0_0 = arith.constant 0 : index
    %0 = vector.load %arg1[%c0, %c0_0] : memref<16x32xf32, #tpu.memory_space<vmem>>, vector<16x32xf32>
    %1 = arith.truncf %0 : vector<16x32xf32> to vector<16x32xbf16>
    %c0_1 = arith.constant 0 : index
    %c0_2 = arith.constant 0 : index
    %2 = vector.load %arg2[%c0_1, %c0_2] : memref<32x128xbf16, #tpu.memory_space<vmem>>, vector<32x128xbf16>
    %cst = arith.constant dense<0.000000e+00> : vector<16x128xf32>
    %3 = tpu.matmul %1, %2, %cst {dimension_numbers = #tpu.dot_dimension_numbers<[1], [0], [0], [1], [0, 0, 1, 1], [], []>} : vector<16x32xbf16>, vector<32x128xbf16>, vector<16x128xf32> -> vector<16x128xf32>
    %c0_3 = arith.constant 0 : index
    %c0_4 = arith.constant 0 : index
    %4 = vector.load %arg3[%c0_3, %c0_4] : memref<1x128xf32, #tpu.memory_space<vmem>>, vector<1x128xf32>
    %5 = vector.broadcast %4 : vector<1x128xf32> to vector<16x128xf32>
    %6 = arith.addf %3, %5 : vector<16x128xf32>
    %cst_5 = arith.constant 0.000000e+00 : f32
    %7 = vector.broadcast %cst_5 : f32 to vector<16x128xf32>
    %8 = arith.maximumf %6, %7 : vector<16x128xf32>
    %9 = arith.truncf %8 : vector<16x128xf32> to vector<16x128xbf16>
    %c0_6 = arith.constant 0 : index
    %c0_7 = arith.constant 0 : index
    %10 = vector.load %arg4[%c0_6, %c0_7] : memref<128x128xbf16, #tpu.memory_space<vmem>>, vector<128x128xbf16>
    %cst_8 = arith.constant dense<0.000000e+00> : vector<16x128xf32>
    %11 = tpu.matmul %9, %10, %cst_8 {dimension_numbers = #tpu.dot_dimension_numbers<[1], [0], [0], [1], [0, 0, 1, 1], [], []>} : vector<16x128xbf16>, vector<128x128xbf16>, vector<16x128xf32> -> vector<16x128xf32>
    %c0_9 = arith.constant 0 : index
    %c0_10 = arith.constant 0 : index
    %12 = vector.load %arg5[%c0_9, %c0_10] : memref<1x128xf32, #tpu.memory_space<vmem>>, vector<1x128xf32>
    %13 = vector.broadcast %12 : vector<1x128xf32> to vector<16x128xf32>
    %14 = arith.addf %11, %13 : vector<16x128xf32>
    %cst_11 = arith.constant 0.000000e+00 : f32
    %15 = vector.broadcast %cst_11 : f32 to vector<16x128xf32>
    %16 = arith.maximumf %14, %15 : vector<16x128xf32>
    %17 = arith.truncf %16 : vector<16x128xf32> to vector<16x128xbf16>
    %c0_12 = arith.constant 0 : index
    %c0_13 = arith.constant 0 : index
    %18 = vector.load %arg6[%c0_12, %c0_13] : memref<16x128xbf16, #tpu.memory_space<vmem>>, vector<16x128xbf16>
    tpu.vector_store %arg6[%c0_12, %c0_13], %17 {strides = array<i32>} : memref<16x128xbf16, #tpu.memory_space<vmem>>, vector<16x128xbf16>,
    return
  }
  func.func @transform_0(%arg0: i32) -> (i32, i32) {
    %c0_i32 = arith.constant 0 : i32
    %c0_i32_0 = arith.constant 0 : i32
    return %arg0, %c0_i32 : i32, i32
  }
  func.func @transform_1(%arg0: i32) -> (i32, i32) {
    %c0_i32 = arith.constant 0 : i32
    %c0_i32_0 = arith.constant 0 : i32
    %c0_i32_1 = arith.constant 0 : i32
    return %c0_i32, %c0_i32_0 : i32, i32
  }
  func.func @transform_2(%arg0: i32) -> (i32, i32) {
    %c0_i32 = arith.constant 0 : i32
    %c0_i32_0 = arith.constant 0 : i32
    %c0_i32_1 = arith.constant 0 : i32
    return %c0_i32, %c0_i32_0 : i32, i32
  }
  func.func @transform_3(%arg0: i32) -> (i32, i32) {
    %c0_i32 = arith.constant 0 : i32
    %c0_i32_0 = arith.constant 0 : i32
    %c0_i32_1 = arith.constant 0 : i32
    return %c0_i32, %c0_i32_0 : i32, i32
  }
  func.func @transform_4(%arg0: i32) -> (i32, i32) {
    %c0_i32 = arith.constant 0 : i32
    %c0_i32_0 = arith.constant 0 : i32
    %c0_i32_1 = arith.constant 0 : i32
    return %c0_i32, %c0_i32_0 : i32, i32
  }
  func.func @transform_5(%arg0: i32) -> (i32, i32) {
    %c0_i32 = arith.constant 0 : i32
    %c0_i32_0 = arith.constant 0 : i32
    return %arg0, %c0_i32 : i32, i32
  }
}

</mosaic_0001>

<bundles_post_ra>
// kernel: tpu_custom_call.1
= control target key start
LH: loop header
LB: loop body
LE: loop exit
PB: predicated region body
PF: predicated region fallthrough
CT: control target
= control target key end

     0   :  { %10 = vsyncpa [#allocation3], 0  ;;  %s514_s0 = inlined_call_operand.hbm [shape: f32[8,32], index: 0, kind: input, shape index: {}]   ;;  %s515_s1 = inlined_call_operand.hbm [shape: bf16[32,128], index: 1, kind: input, shape index: {}]   ;;  %s516_s2 = inlined_call_operand.vmem [shape: f32[1,128], index: 2, kind: input, shape index: {}]   ;;  %s517_s3 = inlined_call_operand.hbm [shape: bf16[128,128], index: 3, kind: input, shape index: {}]   ;;  %s518_s4 = inlined_call_operand.vmem [shape: f32[1,128], index: 4, kind: input, shape index: {}]   ;;  %s519_s5 = inlined_call_operand.hbm [shape: bf16[8,128], index: 5, kind: output, shape index: {}]  }
   0x1   :  { %11 = vsyncpa [#allocation6], 0 }
   0x2   :  { %12 = vsyncpa [#allocation4], 0 }
   0x3   :  { %17 = vsyncadd [#allocation3], 128  ;;  %s447_s18 = smov [#allocation5]  }
   0x4   :  { %s30_s19 = sshll.u32 %s447_s18, 4  ;;  %s31_s19 = int_to_ptr.vmem [resolvable:$true] %s30_s19 }
   0x5   :  { %s369_s20 = scalar_lea.vmem %s31_s19, 256  ;;  %p374_p1 = scmp.lt.s32.totalorder %s31_s19, %s31_s19 }
   0x6   :  { %p370_p0 = scmp.ne.s32.totalorder %s31_s19, %s369_s20  ;;  %p375_p2 = scmp.lt.s32.totalorder %s369_s20, %s369_s20 }
   0x8   :  { %p376_p3 = por %p375_p2, %p374_p1 }
   0xa   :  { %p377_p4 = pnand %p376_p3, %p370_p0 }
   0xc   :  { %380 = shalt.err (!%p377_p4)
}
   0xd   :  { %s448_s21 = smov 64   ;;  %s449_s22 = smov 4  }
   0xe   :  { %36 = dma.hbm_to_vmem [thread:$0]  %s515_s1, 256, %s31_s19, [#allocation6], %s448_s21, %s448_s21, %s449_s22  }
   0xf   :  { %s450_s25 = smov [#allocation2]  }
  0x10   :  { %s18_s26 = sshll.u32 %s450_s25, 4  ;;  %s19_s26 = int_to_ptr.vmem [resolvable:$true] %s18_s26 }
  0x11   :  { %s389_s27 = scalar_lea.vmem %s19_s26, 128  ;;  %s393_s28 = scalar_lea.vmem %s19_s26, 256 }
  0x12   :  { %p390_p5 = scmp.ne.s32.totalorder %s19_s26, %s389_s27  ;;  %p394_p6 = scmp.lt.s32.totalorder %s19_s26, %s19_s26 }
  0x13   :  { %p395_p7 = scmp.lt.s32.totalorder %s393_s28, %s389_s27 }
  0x15   :  { %p396_p8 = por %p395_p7, %p394_p6 }
  0x17   :  { %p397_p9 = pnand %p396_p8, %p390_p5 }
  0x19   :  { %400 = shalt.err (!%p397_p9)
}
  0x1a   :  { %s451_s29 = smov 128   ;;  %s452_s30 = smov 8  }
  0x1b   :  { %24 = dma.hbm_to_vmem [thread:$0]  %s514_s0, 128, %s19_s26, [#allocation3], %s451_s29, %s451_s29, %s452_s30  }
  0x1c   :  { %s453_s8 = smov [#allocation7]  }
  0x1d   :  { %s44_s9 = sshll.u32 %s453_s8, 4  ;;  %s45_s9 = int_to_ptr.vmem [resolvable:$true] %s44_s9 }
  0x1e   :  { %s409_s1 = scalar_lea.vmem %s45_s9, 1024  ;;  %p414_p11 = scmp.lt.s32.totalorder %s45_s9, %s45_s9 }
  0x1f   :  { %p410_p10 = scmp.ne.s32.totalorder %s45_s9, %s409_s1  ;;  %p415_p12 = scmp.lt.s32.totalorder %s409_s1, %s409_s1 }
  0x21   :  { %p416_p13 = por %p415_p12, %p414_p11 }
  0x23   :  { %p417_p0 = pnand %p416_p13, %p410_p10 }
  0x25   :  { %420 = shalt.err (!%p417_p0)
}
  0x26   :  { %50 = dma.hbm_to_vmem [thread:$0]  %s517_s3, 1024, %s45_s9, [#allocation6], %s448_s21, %s448_s21, %s449_s22  }
  0x27   :  { %441 = dma.done.wait [#allocation3], 256  }
  0x28   :  { %442 = vsyncadd [#allocation3], 4294967040 }
  0x29   :  { %443 = dma.done.wait [#allocation6], 1280  }
  0x2a   :  { %444 = vsyncadd [#allocation6], 4294966016  ;;  %v454_v0 = vmov 0.0   ;;  %vm455_vm0 = vmmov 0   ;;  %v351_v1 = vld [vmem:[#allocation5 + $0x8] sm:$0xff]   ;;  %v352_v2 = vld [vmem:[#allocation5] sm:$0xff]  }
  0x2b   :  { %313 = vmatprep.subr.bf16.mxu0 %v454_v0  ;;  %317 = vmatprep.mubr.msk.bf16.mxu0 %vm455_vm0, %v454_v0  ;;  %v63_v3 = vld [vmem:[#allocation2] sm:$0xff]  ;;  %v64_v4 = vld [vmem:[#allocation2 + $0x8] sm:$0xff]  ;;  %v353_v5 = vld [vmem:[#allocation7 + $0x38] sm:$0xff]   ;;  %vm89_vm1 = vcmask 261120  }
  0x2c   :  { %321 = vmatprep.subr.bf16.mxu1 %v454_v0  ;;  %337 = vmatprep.mubr.msk.bf16.mxu1 %vm455_vm0, %v454_v0  ;;  %v65_v6 = vpack.c.bf16 %v64_v4, %v63_v3  ;;  %v354_v7 = vld [vmem:[#allocation7 + $0x30] sm:$0xff]   ;;  %v355_v8 = vld [vmem:[#allocation7 + $0x28] sm:$0xff]   ;;  %v356_v9 = vld [vmem:[#allocation7 + $0x20] sm:$0xff]  }
  0x2d   :  { %314 = vmatpush3.bf16.msra.mxu0 %v351_v1  ;;  %322 = vmatpush3.bf16.msra.mxu1 %v353_v5  ;;  %v357_v10 = vld [vmem:[#allocation7 + $0x18] sm:$0xff]   ;;  %v358_v11 = vld [vmem:[#allocation7 + $0x10] sm:$0xff]   ;;  %v359_v12 = vld [vmem:[#allocation7 + $0x8] sm:$0xff]  }
  0x2e   :  { %315 = vmatprep.subr.bf16.mxu0 %v454_v0  ;;  %323 = vmatprep.subr.bf16.mxu1 %v454_v0  ;;  %v360_v13 = vld [vmem:[#allocation7] sm:$0xff]  }
  0x2f   :  { %v279_v14 = vld [vmem:[%s516_s2] ss:$0 sm:$0xff] }
  0x30   :  { %v283_v24 = vld [vmem:[%s518_s4] ss:$0 sm:$0xff] }
  0x31   :  { %316 = vmatpush3.bf16.msra.mxu0 %v352_v2  ;;  %324 = vmatpush3.bf16.msra.mxu1 %v354_v7 }
  0x32   :  { %325 = vmatprep.subr.bf16.mxu1 %v454_v0 }
  0x34   :  { %318 = vmatmul.mubr.msk.bf16.vlgmr.msra.gmra.mxu0 %vm89_vm1, %v65_v6 }
  0x35   :  { %326 = vmatpush3.bf16.msra.mxu1 %v355_v8 }
  0x36   :  { %327 = vmatprep.subr.bf16.mxu1 %v454_v0 }
  0x39   :  { %328 = vmatpush3.bf16.msra.mxu1 %v356_v9 }
  0x3a   :  { %329 = vmatprep.subr.bf16.mxu1 %v454_v0 }
  0x3d   :  { %330 = vmatpush3.bf16.msra.mxu1 %v357_v10 }
  0x3e   :  { %331 = vmatprep.subr.bf16.mxu1 %v454_v0 }
  0x41   :  { %332 = vmatpush3.bf16.msra.mxu1 %v358_v11 }
  0x42   :  { %333 = vmatprep.subr.bf16.mxu1 %v454_v0 }
  0x45   :  { %334 = vmatpush3.bf16.msra.mxu1 %v359_v12 }
  0x46   :  { %335 = vmatprep.subr.bf16.mxu1 %v454_v0 }
  0x49   :  { %336 = vmatpush3.bf16.msra.mxu1 %v360_v13 }
  0xf4   :  { %v127_v15 = vpop.f32.mrf.mxu0 }
  0xf5   :  { %v128_v17 = vadd.f32 %v279_v14, %v127_v15 }
  0xf6   :  { %v319_v16 = vpop.f32.mrf.mxu0 }
  0xf7   :  { %v134_v21 = vmax.f32 %v128_v17, 0.0 }
  0xf8   :  { %v130_v18 = vpop.f32.mrf.mxu0 }
  0xf9   :  { %v131_v19 = vadd.f32 %v279_v14, %v130_v18 }
  0xfa   :  { %v320_v20 = vpop.f32.mrf.mxu0 }
  0xfb   :  { %v135_v22 = vmax.f32 %v131_v19, 0.0 }
  0xfd   :  { %v136_v23 = vpack.c.bf16 %v135_v22, %v134_v21 }
  0xff   :  { %338 = vmatmul.mubr.bf16.vlgmr.msra.gmra.mxu1 %v136_v23 }
 0x1bf   :  { %v242_v25 = vpop.f32.mrf.mxu1 }
 0x1c0   :  { %v243_v27 = vadd.f32 %v283_v24, %v242_v25 }
 0x1c1   :  { %v339_v26 = vpop.f32.mrf.mxu1 }
 0x1c2   :  { %v249_v31 = vmax.f32 %v243_v27, 0.0 }
 0x1c3   :  { %v245_v28 = vpop.f32.mrf.mxu1 }
 0x1c4   :  { %v246_v29 = vadd.f32 %v283_v24, %v245_v28 }
 0x1c5   :  { %v340_v30 = vpop.f32.mrf.mxu1 }
 0x1c6   :  { %v250_v32 = vmax.f32 %v246_v29, 0.0 }
 0x1c8   :  { %v299_v33 = vpack.c.bf16 %v250_v32, %v249_v31 }
 0x1ca   :  { %300 = vst [vmem:[#allocation8] sm:$0xff] %v299_v33  }
 0x1cb   :  { %265 = vsyncadd [#allocation4], 64  ;;  %s456_s2 = smov [#allocation8]  }
 0x1cc   :  { %s266_s14 = sshll.u32 %s456_s2, 4  ;;  %s267_s14 = int_to_ptr.vmem [resolvable:$true] %s266_s14 }
 0x1cd   :  { %s421_s15 = scalar_lea.vmem %s267_s14, 64  ;;  %s425_s16 = scalar_lea.vmem %s267_s14, 128 }
 0x1ce   :  { %p422_p1 = scmp.ne.s32.totalorder %s267_s14, %s421_s15  ;;  %p426_p2 = scmp.lt.s32.totalorder %s267_s14, %s267_s14 }
 0x1cf   :  { %p427_p3 = scmp.lt.s32.totalorder %s425_s16, %s421_s15 }
 0x1d1   :  { %p428_p4 = por %p427_p3, %p426_p2 }
 0x1d3   :  { %p429_p5 = pnand %p428_p4, %p422_p1 }
 0x1d5   :  { %432 = shalt.err (!%p429_p5)
}
 0x1d6   :  { %272 = dma.vmem_to_hbm [thread:$0]  %s267_s14, 64, %s519_s5, [#allocation4], %s448_s21, %s448_s21, %s449_s22  }
 0x1d7   :  { %445 = dma.done.wait [#allocation4], 128  }
 0x1d8   :  { %446 = vsyncadd [#allocation4], 4294967168 }
 0x1d9   :  { %276 = vsyncpa [#allocation3], 1 }
 0x1da   :  { %277 = vsyncpa [#allocation6], 1 }
 0x1db   :  { %278 = vsyncpa [#allocation4], 1 }

</bundles_post_ra>
